<compile_context>
chip_gen: v6e
topology: v6e:2x2x1
jax: 0.10.0
libtpu: 0.0.40
codegen_flags: <defaults>
</compile_context>

<pallas_src>
import functools

import jax
import jax.numpy as jnp
from jax.experimental import pallas as pl
from jax.experimental.pallas import tpu as pltpu


# ----------------------------- math helpers ------------------------------- #

def _hardswish(x):
    # PyTorch Hardswish: x * relu6(x + 3) / 6
    return x * jnp.clip(x + 3.0, 0.0, 6.0) * (1.0 / 6.0)


def _hardsigmoid(x):
    # PyTorch Hardsigmoid: relu6(x + 3) / 6
    return jnp.clip(x + 3.0, 0.0, 6.0) * (1.0 / 6.0)


def _mlp_attention(avg, mx, w1t, b1, w2t, b2):
    """Shared squeeze-excite MLP.  avg/mx: (R, C) f32 -> (R, C) f32 gate."""
    r = avg.shape[0]
    p = jnp.concatenate([avg, mx], axis=0)                         # (2R, C)
    h = jnp.dot(p, w1t, preferred_element_type=jnp.float32) + b1   # (2R, S)
    h = _hardswish(h)
    y = jnp.dot(h, w2t, preferred_element_type=jnp.float32) + b2   # (2R, C)
    return _hardsigmoid(y[:r] + y[r:])                             # (R, C)


# ------------------------- single-pass fused kernel ------------------------ #

def _ca_fused_kernel(x_ref, w1t_ref, b1_ref, w2t_ref, b2_ref, o_ref):
    # x block: (BT, C, HW) -- BT images, all channels, all spatial positions.
    x = x_ref[...]                                    # native dtype, no big cast
    avg = jnp.mean(x, axis=2, dtype=jnp.float32)      # (BT, C), f32 accumulation
    mx = jnp.max(x, axis=2).astype(jnp.float32)       # (BT, C), max is exact

    att = _mlp_attention(avg, mx,
                         w1t_ref[...].astype(jnp.float32),
                         b1_ref[...].astype(jnp.float32),
                         w2t_ref[...].astype(jnp.float32),
                         b2_ref[...].astype(jnp.float32))

    # Gate in x's native dtype: cast the tiny attention tensor, not the tile.
    gate = att.astype(x.dtype)[:, :, None]            # (BT, C, 1)
    o_ref[...] = (gate * x).astype(o_ref.dtype)


# ----------------------- two-pass fallback (huge HW) ----------------------- #

def _ca_pool_kernel(x_ref, sum_ref, max_ref, *, hw_total, hw_tile):
    # grid = (N, num_hw_tiles); accumulate per-image channel sum/max over HW.
    j = pl.program_id(1)

    @pl.when(j == 0)
    def _():
        sum_ref[...] = jnp.zeros_like(sum_ref)
        max_ref[...] = jnp.full_like(max_ref, -jnp.inf)

    x = x_ref[...]                                                 # (1, C, thw)
    lane = jax.lax.broadcasted_iota(jnp.int32, x.shape, 2)
    valid = (j * hw_tile + lane) < hw_total                        # mask ragged tail
    zero = jnp.zeros((), dtype=x.dtype)
    neg = jnp.array(-jnp.inf, dtype=x.dtype)

    s = jnp.sum(jnp.where(valid, x, zero), axis=2, dtype=jnp.float32)   # (1, C)
    m = jnp.max(jnp.where(valid, x, neg), axis=2).astype(jnp.float32)   # (1, C)

    sum_ref[...] += s[None]                                        # (1, 1, C)
    max_ref[...] = jnp.maximum(max_ref[...], m[None])


def _ca_gate_kernel(sum_ref, max_ref, w1t_ref, b1_ref, w2t_ref, b2_ref,
                    x_ref, o_ref, att_sc, *, hw_total):
    # grid = (N, num_hw_tiles); compute attention once per image, gate each tile.
    c = sum_ref.shape[-1]

    @pl.when(pl.program_id(1) == 0)
    def _():
        avg = sum_ref[...].reshape(1, c) * (1.0 / hw_total)        # (1, C) f32
        mx = max_ref[...].reshape(1, c)                            # (1, C) f32
        att_sc[...] = _mlp_attention(avg, mx,
                                     w1t_ref[...].astype(jnp.float32),
                                     b1_ref[...].astype(jnp.float32),
                                     w2t_ref[...].astype(jnp.float32),
                                     b2_ref[...].astype(jnp.float32))

    x = x_ref[...]                                                 # (1, C, thw)
    gate = att_sc[...].astype(x.dtype)[:, :, None]                 # (1, C, 1)
    o_ref[...] = (gate * x).astype(o_ref.dtype)


# ------------------------------ host wrapper ------------------------------- #

def _sublane_padded_channels(c, itemsize):
    """Channel count after sublane padding (VMEM tile accounting)."""
    pack = max(1, 4 // max(itemsize, 1))    # elements per 32-bit sublane word
    g = 8 * pack
    return ((c + g - 1) // g) * g


def channel_attention(x_nchw, w1, b1, w2, b2, *, force_two_pass=False,
                      hw_tile=None):
    """x_nchw: (N, C, H, W); w1: (S, C); b1: (S,); w2: (C, S); b2: (C,)."""
    n, c, h, w = x_nchw.shape
    s = w1.shape[0]
    hw = h * w
    itemsize = x_nchw.dtype.itemsize

    x3 = x_nchw.reshape(n, c, hw)
    # Pre-transpose weights host-side so kernels do (p @ w1t) with no XLU work.
    w1t = jnp.transpose(w1)          # (C, S)
    w2t = jnp.transpose(w2)          # (S, C)
    b1r = b1.reshape(1, s)
    b2r = b2.reshape(1, c)

    c_pad = _sublane_padded_channels(c, itemsize)
    per_image_vmem = c_pad * hw * itemsize

    single_pass_ok = (per_image_vmem <= (12 << 20)) and not force_two_pass

    if single_pass_ok:
        # Largest per-step image count keeping the x block around 4 MiB.
        bt = int(max(1, min(n, (4 << 20) // max(per_image_vmem, 1))))
        grid = (pl.cdiv(n, bt),)
        block_bytes = bt * per_image_vmem
        vmem_limit = int(min(64 << 20,
                             max(32 << 20, 4 * block_bytes + (2 << 20))))

        out3 = pl.pallas_call(
            _ca_fused_kernel,
            out_shape=jax.ShapeDtypeStruct((n, c, hw), x3.dtype),
            grid_spec=pltpu.PrefetchScalarGridSpec(
                num_scalar_prefetch=0,
                grid=grid,
                in_specs=[
                    pl.BlockSpec((bt, c, hw), lambda i: (i, 0, 0)),   # x
                    pl.BlockSpec((c, s), lambda i: (0, 0)),           # w1^T
                    pl.BlockSpec((1, s), lambda i: (0, 0)),           # b1
                    pl.BlockSpec((s, c), lambda i: (0, 0)),           # w2^T
                    pl.BlockSpec((1, c), lambda i: (0, 0)),           # b2
                ],
                out_specs=pl.BlockSpec((bt, c, hw), lambda i: (i, 0, 0)),
            ),
            compiler_params=pltpu.CompilerParams(
                dimension_semantics=("parallel",),
                vmem_limit_bytes=vmem_limit),
        )(x3, w1t, b1r, w2t, b2r)
        return out3.reshape(n, c, h, w)

    # --------- two-pass fallback: HW-tiled pooling, then HW-tiled gating ----
    if hw_tile is None:
        thw = max(128, ((2 << 20) // max(c_pad * itemsize, 1)) // 128 * 128)
    else:
        thw = max(128, (int(hw_tile) // 128) * 128)
    if thw >= hw:
        thw = hw
    n_hw = pl.cdiv(hw, thw)
    tile_bytes = c_pad * thw * itemsize
    vmem_limit = int(min(64 << 20, max(32 << 20, 4 * tile_bytes + (2 << 20))))

    sum_p, max_p = pl.pallas_call(
        functools.partial(_ca_pool_kernel, hw_total=hw, hw_tile=thw),
        out_shape=(jax.ShapeDtypeStruct((n, 1, c), jnp.float32),
                   jax.ShapeDtypeStruct((n, 1, c), jnp.float32)),
        grid_spec=pltpu.PrefetchScalarGridSpec(
            num_scalar_prefetch=0,
            grid=(n, n_hw),
            in_specs=[pl.BlockSpec((1, c, thw), lambda i, j: (i, 0, j))],
            out_specs=(pl.BlockSpec((1, 1, c), lambda i, j: (i, 0, 0)),
                       pl.BlockSpec((1, 1, c), lambda i, j: (i, 0, 0))),
        ),
        compiler_params=pltpu.CompilerParams(
            dimension_semantics=("parallel", "arbitrary"),
            vmem_limit_bytes=vmem_limit),
    )(x3)

    out3 = pl.pallas_call(
        functools.partial(_ca_gate_kernel, hw_total=hw),
        out_shape=jax.ShapeDtypeStruct((n, c, hw), x3.dtype),
        grid_spec=pltpu.PrefetchScalarGridSpec(
            num_scalar_prefetch=0,
            grid=(n, n_hw),
            in_specs=[
                pl.BlockSpec((1, 1, c), lambda i, j: (i, 0, 0)),     # pooled sum
                pl.BlockSpec((1, 1, c), lambda i, j: (i, 0, 0)),     # pooled max
                pl.BlockSpec((c, s), lambda i, j: (0, 0)),           # w1^T
                pl.BlockSpec((1, s), lambda i, j: (0, 0)),           # b1
                pl.BlockSpec((s, c), lambda i, j: (0, 0)),           # w2^T
                pl.BlockSpec((1, c), lambda i, j: (0, 0)),           # b2
                pl.BlockSpec((1, c, thw), lambda i, j: (i, 0, j)),   # x
            ],
            out_specs=pl.BlockSpec((1, c, thw), lambda i, j: (i, 0, j)),
            scratch_shapes=[pltpu.VMEM((1, c), jnp.float32)],        # attention
        ),
        compiler_params=pltpu.CompilerParams(
            dimension_semantics=("parallel", "arbitrary"),
            vmem_limit_bytes=vmem_limit),
    )(sum_p, max_p, w1t, b1r, w2t, b2r, x3)
    return out3.reshape(n, c, h, w)


# ------------------------------- reference --------------------------------- #

def channel_attention_ref(x, w1, b1, w2, b2):
    """Pure-JAX reference mirroring the PyTorch forward."""
    xf = x.astype(jnp.float32)
    avg = jnp.mean(xf, axis=(2, 3))                            # (N, C)
    mx = jnp.max(xf, axis=(2, 3))                              # (N, C)

    def dense(p):                                              # (N, C)
        h = _hardswish(p @ w1.T + b1)                          # (N, S)
        return h @ w2.T + b2                                   # (N, C)

    att = _hardsigmoid(dense(avg) + dense(mx))                 # (N, C)
    return (att[:, :, None, None] * xf).astype(x.dtype)


if __name__ == "__main__":
    key = jax.random.PRNGKey(0)
    kx, k1, kb1, k2, kb2, kx2 = jax.random.split(key, 6)

    # Shapes consistent with the module: in_planes=4, shrink_factor=4.
    N, C, H, W = 2, 4, 16, 16
    S = C // 4  # shrink_dim

    x = jax.random.normal(kx, (N, C, H, W), dtype=jnp.float32)
    # Conv 1x1 weights == dense weights (squeezed (out, in, 1, 1)).
    w1 = jax.random.normal(k1, (S, C), dtype=jnp.float32) * 0.5
    b1 = jax.random.normal(kb1, (S,), dtype=jnp.float32) * 0.1
    w2 = jax.random.normal(k2, (C, S), dtype=jnp.float32) * 0.5
    b2 = jax.random.normal(kb2, (C,), dtype=jnp.float32) * 0.1

    # Path 1: fused single-pass kernel.
    out = jax.block_until_ready(channel_attention(x, w1, b1, w2, b2))
    ref = channel_attention_ref(x, w1, b1, w2, b2)
    assert out.shape == (N, C, H, W)
    assert jnp.allclose(out, ref, atol=1e-5, rtol=1e-5), "single-pass mismatch"

    # Path 2: HW-tiled two-pass fallback (ragged last tile: 400 = 3*128 + 16).
    H2, W2 = 20, 20
    x2 = jax.random.normal(kx2, (N, C, H2, W2), dtype=jnp.float32)
    out2 = jax.block_until_ready(
        channel_attention(x2, w1, b1, w2, b2, force_two_pass=True, hw_tile=128))
    ref2 = channel_attention_ref(x2, w1, b1, w2, b2)
    assert out2.shape == (N, C, H2, W2)
    assert jnp.allclose(out2, ref2, atol=1e-5, rtol=1e-5), "two-pass mismatch"

    print("KERNEL_OK")
</pallas_src>

<mosaic_0001>
module attributes {stable_mosaic.version = 11 : i64} {
  func.func @_ca_fused_kernel(%arg0: i32, %arg1: memref<2x4x256xf32, #tpu.memory_space<vmem>>, %arg2: memref<4x1xf32, #tpu.memory_space<vmem>>, %arg3: memref<1x1xf32, #tpu.memory_space<vmem>>, %arg4: memref<1x4xf32, #tpu.memory_space<vmem>>, %arg5: memref<1x4xf32, #tpu.memory_space<vmem>>, %arg6: memref<2x4x256xf32, #tpu.memory_space<vmem>>) attributes {dimension_semantics = [#tpu.dimension_semantics<parallel>], iteration_bounds = array<i64: 1>, scalar_prefetch = 0 : i64, scratch_operands = 0 : i64, tpu.core_type = #tpu.core_type<tc>, window_params = [{transform_indices = @transform_0, window_bounds = array<i64: 2, 4, 256>}, {pipeline_mode = #tpu.pipeline_mode<synchronous>, transform_indices = @transform_1, window_bounds = array<i64: 4, 1>}, {pipeline_mode = #tpu.pipeline_mode<synchronous>, transform_indices = @transform_2, window_bounds = array<i64: 1, 1>}, {pipeline_mode = #tpu.pipeline_mode<synchronous>, transform_indices = @transform_3, window_bounds = array<i64: 1, 4>}, {pipeline_mode = #tpu.pipeline_mode<synchronous>, transform_indices = @transform_4, window_bounds = array<i64: 1, 4>}, {transform_indices = @transform_5, window_bounds = array<i64: 2, 4, 256>}]} {
    %c0 = arith.constant 0 : index
    %c0_0 = arith.constant 0 : index
    %c0_1 = arith.constant 0 : index
    %0 = vector.load %arg1[%c0, %c0_0, %c0_1] : memref<2x4x256xf32, #tpu.memory_space<vmem>>, vector<2x4x256xf32>
    %cst = arith.constant dense<0.000000e+00> : vector<2x4xf32>
    %1 = vector.multi_reduction <add>, %0, %cst [2] : vector<2x4x256xf32> to vector<2x4xf32>
    %cst_2 = arith.constant 2.560000e+02 : f32
    %2 = vector.broadcast %cst_2 : f32 to vector<2x4xf32>
    %3 = arith.divf %1, %2 : vector<2x4xf32>
    %cst_3 = arith.constant dense<0xFF800000> : vector<2x4xf32>
    %4 = vector.multi_reduction <maximumf>, %0, %cst_3 [2] : vector<2x4x256xf32> to vector<2x4xf32>
    %c0_4 = arith.constant 0 : index
    %c0_5 = arith.constant 0 : index
    %5 = vector.load %arg2[%c0_4, %c0_5] : memref<4x1xf32, #tpu.memory_space<vmem>>, vector<4x1xf32>
    %c0_6 = arith.constant 0 : index
    %c0_7 = arith.constant 0 : index
    %6 = vector.load %arg3[%c0_6, %c0_7] : memref<1x1xf32, #tpu.memory_space<vmem>>, vector<1x1xf32>
    %c0_8 = arith.constant 0 : index
    %c0_9 = arith.constant 0 : index
    %7 = vector.load %arg4[%c0_8, %c0_9] : memref<1x4xf32, #tpu.memory_space<vmem>>, vector<1x4xf32>
    %c0_10 = arith.constant 0 : index
    %c0_11 = arith.constant 0 : index
    %8 = vector.load %arg5[%c0_10, %c0_11] : memref<1x4xf32, #tpu.memory_space<vmem>>, vector<1x4xf32>
    %9 = tpu.concatenate %3, %4 in 0 : vector<2x4xf32>, vector<2x4xf32> -> vector<4x4xf32>
    %cst_12 = arith.constant dense<0.000000e+00> : vector<4x1xf32>
    %10 = tpu.matmul %9, %5, %cst_12 {dimension_numbers = #tpu.dot_dimension_numbers<[1], [0], [0], [1], [0, 0, 1, 1], [], []>} : vector<4x4xf32>, vector<4x1xf32>, vector<4x1xf32> -> vector<4x1xf32>
    %11 = vector.broadcast %6 : vector<1x1xf32> to vector<4x1xf32>
    %12 = arith.addf %10, %11 : vector<4x1xf32>
    %cst_13 = arith.constant 3.000000e+00 : f32
    %13 = vector.broadcast %cst_13 : f32 to vector<4x1xf32>
    %14 = arith.addf %12, %13 : vector<4x1xf32>
    %cst_14 = arith.constant 0.000000e+00 : f32
    %cst_15 = arith.constant 6.000000e+00 : f32
    %15 = vector.broadcast %cst_14 : f32 to vector<4x1xf32>
    %16 = arith.maximumf %15, %14 : vector<4x1xf32>
    %17 = vector.broadcast %cst_15 : f32 to vector<4x1xf32>
    %18 = arith.minimumf %17, %16 : vector<4x1xf32>
    %19 = arith.mulf %12, %18 : vector<4x1xf32>
    %cst_16 = arith.constant 0.166666672 : f32
    %20 = vector.broadcast %cst_16 : f32 to vector<4x1xf32>
    %21 = arith.mulf %19, %20 : vector<4x1xf32>
    %cst_17 = arith.constant dense<0.000000e+00> : vector<4x4xf32>
    %22 = tpu.matmul %21, %7, %cst_17 {dimension_numbers = #tpu.dot_dimension_numbers<[1], [0], [0], [1], [0, 0, 1, 1], [], []>} : vector<4x1xf32>, vector<1x4xf32>, vector<4x4xf32> -> vector<4x4xf32>
    %23 = vector.broadcast %8 : vector<1x4xf32> to vector<4x4xf32>
    %24 = arith.addf %22, %23 : vector<4x4xf32>
    %25 = vector.extract_strided_slice %24 {offsets = [0, 0], sizes = [2, 4], strides = [1, 1]} : vector<4x4xf32> to vector<2x4xf32>
    %26 = vector.extract_strided_slice %24 {offsets = [2, 0], sizes = [2, 4], strides = [1, 1]} : vector<4x4xf32> to vector<2x4xf32>
    %27 = arith.addf %25, %26 : vector<2x4xf32>
    %cst_18 = arith.constant 3.000000e+00 : f32
    %28 = vector.broadcast %cst_18 : f32 to vector<2x4xf32>
    %29 = arith.addf %27, %28 : vector<2x4xf32>
    %cst_19 = arith.constant 0.000000e+00 : f32
    %cst_20 = arith.constant 6.000000e+00 : f32
    %30 = vector.broadcast %cst_19 : f32 to vector<2x4xf32>
    %31 = arith.maximumf %30, %29 : vector<2x4xf32>
    %32 = vector.broadcast %cst_20 : f32 to vector<2x4xf32>
    %33 = arith.minimumf %32, %31 : vector<2x4xf32>
    %cst_21 = arith.constant 0.166666672 : f32
    %34 = vector.broadcast %cst_21 : f32 to vector<2x4xf32>
    %35 = arith.mulf %33, %34 : vector<2x4xf32>
    %36 = vector.shape_cast %35 : vector<2x4xf32> to vector<2x4x1xf32>
    %37 = vector.broadcast %36 : vector<2x4x1xf32> to vector<2x4x256xf32>
    %38 = arith.mulf %37, %0 : vector<2x4x256xf32>
    %c0_22 = arith.constant 0 : index
    %c0_23 = arith.constant 0 : index
    %c0_24 = arith.constant 0 : index
    %39 = vector.load %arg6[%c0_22, %c0_23, %c0_24] : memref<2x4x256xf32, #tpu.memory_space<vmem>>, vector<2x4x256xf32>
    tpu.vector_store %arg6[%c0_22, %c0_23, %c0_24], %38 {strides = array<i32>} : memref<2x4x256xf32, #tpu.memory_space<vmem>>, vector<2x4x256xf32>,
    return
  }
  func.func @transform_0(%arg0: i32) -> (i32, i32, i32) {
    %c0_i32 = arith.constant 0 : i32
    %c0_i32_0 = arith.constant 0 : i32
    %c0_i32_1 = arith.constant 0 : i32
    return %arg0, %c0_i32, %c0_i32_0 : i32, i32, i32
  }
  func.func @transform_1(%arg0: i32) -> (i32, i32) {
    %c0_i32 = arith.constant 0 : i32
    %c0_i32_0 = arith.constant 0 : i32
    %c0_i32_1 = arith.constant 0 : i32
    return %c0_i32, %c0_i32_0 : i32, i32
  }
  func.func @transform_2(%arg0: i32) -> (i32, i32) {
    %c0_i32 = arith.constant 0 : i32
    %c0_i32_0 = arith.constant 0 : i32
    %c0_i32_1 = arith.constant 0 : i32
    return %c0_i32, %c0_i32_0 : i32, i32
  }
  func.func @transform_3(%arg0: i32) -> (i32, i32) {
    %c0_i32 = arith.constant 0 : i32
    %c0_i32_0 = arith.constant 0 : i32
    %c0_i32_1 = arith.constant 0 : i32
    return %c0_i32, %c0_i32_0 : i32, i32
  }
  func.func @transform_4(%arg0: i32) -> (i32, i32) {
    %c0_i32 = arith.constant 0 : i32
    %c0_i32_0 = arith.constant 0 : i32
    %c0_i32_1 = arith.constant 0 : i32
    return %c0_i32, %c0_i32_0 : i32, i32
  }
  func.func @transform_5(%arg0: i32) -> (i32, i32, i32) {
    %c0_i32 = arith.constant 0 : i32
    %c0_i32_0 = arith.constant 0 : i32
    %c0_i32_1 = arith.constant 0 : i32
    return %arg0, %c0_i32, %c0_i32_0 : i32, i32, i32
  }
}

</mosaic_0001>

<bundles_post_ra>
// kernel: tpu_custom_call.1
= control target key start
LH: loop header
LB: loop body
LE: loop exit
PB: predicated region body
PF: predicated region fallthrough
CT: control target
= control target key end

     0   :  { %s493_s0 = inlined_call_operand.hbm [shape: f32[2,4,256], index: 0, kind: input, shape index: {}]   ;;  %s494_s1 = inlined_call_operand.vmem [shape: f32[4,1], index: 1, kind: input, shape index: {}]   ;;  %s495_s2 = inlined_call_operand.<no memory space> [shape: f32[1,1], index: 2, kind: input, shape index: {}]   ;;  %s496_s3 = inlined_call_operand.vmem [shape: f32[1,4], index: 3, kind: input, shape index: {}]   ;;  %s497_s4 = inlined_call_operand.vmem [shape: f32[1,4], index: 4, kind: input, shape index: {}]   ;;  %s498_s5 = inlined_call_operand.hbm [shape: f32[2,4,256], index: 5, kind: output, shape index: {}]  }
   0x1   :  { %v10_v0 = vstv %s495_s2 }
   0x2   :  { %11 = vst [vmem:[#allocation2] sm:$0x1] %v10_v0 }
   0x3   :  { %12 = vsyncpa [#allocation4], 0 }
   0x4   :  { %13 = vsyncpa [#allocation5], 0  ;;  %s400_s20 = smov [#allocation3]  }
   0x5   :  { %s19_s21 = sshll.u32 %s400_s20, 4  ;;  %s20_s21 = int_to_ptr.vmem [resolvable:$true] %s19_s21 }
   0x6   :  { %s364_s22 = scalar_lea.vmem %s20_s21, 256  ;;  %p369_p1 = scmp.lt.s32.totalorder %s20_s21, %s20_s21 }
   0x7   :  { %p365_p0 = scmp.ne.s32.totalorder %s20_s21, %s364_s22  ;;  %p370_p2 = scmp.lt.s32.totalorder %s364_s22, %s364_s22 }
   0x9   :  { %p371_p3 = por %p370_p2, %p369_p1 }
   0xb   :  { %p372_p4 = pnand %p371_p3, %p365_p0 }
   0xd   :  { %375 = shalt.err (!%p372_p4)
}
   0xe   :  { %s401_s23 = smov 128   ;;  %s402_s24 = smov 8  }
   0xf   :  { %25 = dma.hbm_to_vmem [thread:$0]  %s493_s0, 256, %s20_s21, [#allocation4], %s401_s23, %s401_s23, %s402_s24  }
  0x10   :  { %396 = dma.done.wait [#allocation4], 256  }
  0x11   :  { %397 = vsyncadd [#allocation4], 4294967040  ;;  %vm45_vm0 = vcmask 1043456   ;;  %v445_v1 = vld [vmem:[#allocation3] sm:$0xff]  ;;  %v447_v2 = vld [vmem:[#allocation3 + $0x8] sm:$0xff]  ;;  %v403_v18 = vmov 0.0   ;;  %v75_v19 = vlaneseq }
  0x12   :  { %v451_v3 = vcombine.high %v445_v1, %v445_v1  ;;  %v59_v4 = vsel %vm45_vm0, %v445_v1, -inf  ;;  %v46_v5 = vsel %vm45_vm0, %v445_v1, 0.0  ;;  %v459_v6 = vcombine.high %v447_v2, %v447_v2  ;;  %v69_v17 = vld [vmem:[%s494_s1] sm:$0xf]  ;;  %338 = vmatprep.subr.mxu0 %v403_v18  ;;  %343 = vmatprep.subr.mxu1 %v403_v18 }
  0x13   :  { %v64_v7 = vsel %vm45_vm0, %v447_v2, -inf  ;;  %v51_v8 = vsel %vm45_vm0, %v447_v2, 0.0  ;;  %vm404_vm1 = vmmov 0   ;;  %339 = vmatpush3.msk.msra.mxu0 %vm45_vm0, %v69_v17  ;;  %v76_v20 = vand.u32 127, %v75_v19  ;;  %v71_v36 = vld [vmem:[%s496_s3] sm:$0x1] }
  0x14   :  { %v60_v9 = vsel %vm45_vm0, %v451_v3, -inf  ;;  %v47_v10 = vsel %vm45_vm0, %v451_v3, 0.0  ;;  %v65_v11 = vsel %vm45_vm0, %v459_v6, -inf  ;;  %v52_v12 = vsel %vm45_vm0, %v459_v6, 0.0  ;;  %340 = vmatprep.mubr.msk.f32.mxu0 %vm404_vm1, %v403_v18  ;;  %345 = vmatprep.mubr.msk.f32.mxu1 %vm404_vm1, %v403_v18  ;;  %v328_v37 = vld [vmem:[#allocation2] ss:$0 sm:$0xff] }
  0x15   :  { %v61_v13 = vmax.f32 %v59_v4, %v60_v9  ;;  %v48_v14 = vadd.f32 %v47_v10, %v46_v5  ;;  %v66_v15 = vmax.f32 %v64_v7, %v65_v11  ;;  %v53_v16 = vadd.f32 %v52_v12, %v51_v8  ;;  %v331_v46 = vld [vmem:[%s497_s4] ss:$0 sm:$0xff]  ;;  %s405_s3 = smov [#allocation6]  }
  0x16   :  { %v78_v21 = vshrl.u32 %v75_v19, 7  ;;  %vm98_vm2 = vcmask 1043459   ;;  %vm85_vm3 = vcmask 1041409   ;;  %vm101_vm4 = vcmask 1041408   ;;  %s316_s30 = sshll.u32 %s405_s3, 4  ;;  %s317_s30 = int_to_ptr.vmem [resolvable:$true] %s316_s30 }
  0x17   :  { %62 = vmax.xlane.f32.xlu1 %v61_v13  ;;  %49 = vadd.xlane.f32.xlu0 %v48_v14  ;;  %vm109_vm5 = vcmask 31744   ;;  %vm201_vm6 = vcmask 1040384   ;;  %vm197_vm7 = vcmask 7168   ;;  %s376_s4 = scalar_lea.vmem %s317_s30, 256  ;;  %p381_p6 = scmp.lt.s32.totalorder %s317_s30, %s317_s30 }
  0x18   :  { %v79_v24 = vsub.s32 %v76_v20, %v78_v21  ;;  %344 = vmatpush3.msk.msra.mxu1 %vm201_vm6, %v71_v36  ;;  %v292_v55 = vsub.s32 1, %v78_v21  ;;  %v285_v56 = vsub.s32 0, %v78_v21  ;;  %p377_p5 = scmp.ne.s32.totalorder %s317_s30, %s376_s4  ;;  %p382_p7 = scmp.lt.s32.totalorder %s376_s4, %s376_s4 }
  0x1a   :  { %p383_p8 = por %p382_p7, %p381_p6 }
  0x1b   :  { %67 = vmax.xlane.f32.xlu1 %v66_v15  ;;  %54 = vadd.xlane.f32.xlu0 %v53_v16 }
  0x1c   :  { %p384_p9 = pnand %p383_p8, %p377_p5 }
  0xa0   :  { %v63_v22 = vpop.xlane.xlu1 %62  ;;  %v50_v23 = vpop.xlane.xlu0 %49 }
  0xa1   :  { %v57_v25 = vmul.f32 0.00390625, %v50_v23  ;;  %v93_v30 = vrot.slane %v63_v22, %v79_v24 }
  0xa3   :  { %v80_v31 = vrot.slane %v57_v25, %v79_v24 }
  0xa4   :  { %v68_v26 = vpop.xlane.xlu1 %67  ;;  %v55_v27 = vpop.xlane.xlu0 %54 }
  0xa5   :  { %v97_v28 = vrot.slane %v68_v26, %v79_v24  ;;  %v58_v29 = vmul.f32 0.00390625, %v55_v27 }
  0xa7   :  { %v84_v32 = vrot.slane %v58_v29, %v79_v24  ;;  %v99_v33 = vsel %vm98_vm2, %v97_v28, %v93_v30 }
  0xa9   :  { %v86_v34 = vsel %vm85_vm3, %v84_v32, %v80_v31 }
  0xaa   :  { %v102_v35 = vsel %vm101_vm4, %v86_v34, %v99_v33 }
  0xab   :  { %341 = vmatmul.mubr.msk.f32.vlgmr.msra.gmra.mxu0 %vm109_vm5, %v102_v35 }
 0x16b   :  { %v182_v38 = vpop.f32.mrf.mxu0 }
 0x16c   :  { %v183_v39 = vadd.f32 %v328_v37, %v182_v38 }
 0x16d   :  { %v342_v40 = vpop.f32.mrf.mxu0 }
 0x16e   :  { %v186_v41 = vadd.f32 3.0, %v183_v39 }
 0x170   :  { %v187_v42 = vmax.f32 %v186_v41, 0.0 }
 0x172   :  { %v188_v43 = vmin.f32 %v187_v42, 6.0 }
 0x174   :  { %v189_v44 = vmul.f32 %v188_v43, %v183_v39 }
 0x176   :  { %v190_v45 = vmul.f32 0.16666667, %v189_v44 }
 0x178   :  { %346 = vmatmul.mubr.msk.f32.vlgmr.msra.gmra.mxu1 %vm197_vm7, %v190_v45 }
 0x238   :  { %v271_v47 = vpop.f32.mrf.mxu1 }
 0x239   :  { %v272_v48 = vadd.f32 %v331_v46, %v271_v47 }
 0x23a   :  { %v347_v49 = vpop.f32.mrf.mxu1 }
 0x23b   :  { %v276_v50 = vrot.slane %v272_v48, 2 }
 0x23d   :  { %v278_v51 = vadd.f32 %v276_v50, %v272_v48 }
 0x23f   :  { %v279_v52 = vadd.f32 3.0, %v278_v51 }
 0x241   :  { %v280_v53 = vmax.f32 %v279_v52, 0.0 }
 0x243   :  { %v281_v54 = vmin.f32 %v280_v53, 6.0 }
 0x245   :  { %v282_v57 = vmul.f32 0.16666667, %v281_v54 }
 0x247   :  { %v293_v58 = vrot.slane %v282_v57, %v292_v55  ;;  %v286_v59 = vrot.slane %v282_v57, %v285_v56 }
 0x249   :  { %295 = vbcast.lane.b32.xlu1 %v293_v58, 256  ;;  %288 = vbcast.lane.b32.xlu0 %v286_v59, 256 }
 0x2bb   :  { %v296_v60 = vpop.permute.xlu1 %295  ;;  %v289_v61 = vpop.permute.xlu0 %288 }
 0x2bc   :  { %v299_v62 = vmul.f32 %v296_v60, %v447_v2  ;;  %v300_v63 = vmul.f32 %v296_v60, %v459_v6  ;;  %v297_v0 = vmul.f32 %v289_v61, %v445_v1  ;;  %v298_v4 = vmul.f32 %v289_v61, %v451_v3 }
 0x2be   :  { %v306_v5 = vcombine.low %v299_v62, %v300_v63  ;;  %v305_v7 = vcombine.low %v297_v0, %v298_v4 }
 0x2c0   :  { %310 = vst [vmem:[#allocation6 + $0x8] sm:$0xff] %v306_v5  ;;  %309 = vst [vmem:[#allocation6] sm:$0xff] %v305_v7 }
 0x2c1   :  { %387 = shalt.err (!%p384_p9)
}
 0x2c2   :  { %322 = dma.vmem_to_hbm [thread:$0]  %s317_s30, 256, %s498_s5, [#allocation5], %s401_s23, %s401_s23, %s402_s24  }
 0x2c3   :  { %398 = dma.done.wait [#allocation5], 256  }
 0x2c4   :  { %399 = vsyncadd [#allocation5], 4294967040 }
 0x2c5   :  { %326 = vsyncpa [#allocation4], 1 }
 0x2c6   :  { %327 = vsyncpa [#allocation5], 1 }

</bundles_post_ra>
